<compile_context>
chip_gen: v6e
topology: v6e:2x2x1
jax: 0.10.0
libtpu: 0.0.40
codegen_flags: <defaults>
</compile_context>

<pallas_src>
import functools

import jax
import jax.numpy as jnp
from jax.experimental import pallas as pl
from jax.experimental.pallas import tpu as pltpu


_LANE = 128
# Preferred lane widths for the hot-path 2-D view (multiples of 128), widest
# first for lane-dense, unmasked stores.
_COL_CANDIDATES = (2048, 1536, 1024, 768, 512, 384, 256, 128)
# ~4 MiB useful bytes per block: in+out double-buffered = 16 MiB live, well
# inside the 32 MiB scoped-VMEM limit requested below on every generation.
_TARGET_BLOCK_BYTES = 4 * 1024 * 1024
# Explicit scoped-VMEM budget (fits v7x's 64 MiB physical VMEM with headroom,
# raises v5e's 16 MiB default, trivial on v6e).
_VMEM_LIMIT_BYTES = 32 * 1024 * 1024
# Ragged fallback ((1, n) view): lane-axis block, multiple of 128.
_FALLBACK_BLOCK_COLS = 64 * 1024
# Only shard the grid across v7x TensorCores when each core still streams at
# least this many bytes.
_MIN_CORE_BYTES = 1 * 1024 * 1024
# Packed sublane tile per itemsize (f32 -> 8 rows, bf16 -> 16, int8/fp8 -> 32).
_SUBLANE_TILE = {4: 8, 2: 16, 1: 32}


def _global_scaling_kernel(gamma_ref, beta_ref, x_ref, o_ref):
    # gamma_ref / beta_ref: (1,) float32 scalars in SMEM (scalar prefetch).
    # x_ref / o_ref: (block_rows, block_cols) blocks in VMEM.
    g = gamma_ref[0]
    b = beta_ref[0]
    o_ref[...] = (x_ref[...].astype(jnp.float32) * g + b).astype(o_ref.dtype)


@functools.lru_cache(maxsize=1)
def _num_tensorcores() -> int:
    # v7x has 2 TensorCores per chip; v5e / v6e have 1. Heuristic on the
    # device kind string; any failure defaults to the safe single-TC path.
    try:
        kind = jax.devices()[0].device_kind.lower()
    except Exception:
        return 1
    return 2 if "7" in kind else 1


def _affine_2d(x2d, gamma32, beta32):
    rows, cols = x2d.shape
    itemsize = x2d.dtype.itemsize
    sub = _SUBLANE_TILE.get(itemsize, 8)

    # Column blocking: the hot path always has cols <= 2048 (single column
    # block); the ragged fallback has rows == 1 and tiles the lane axis.
    block_cols = _FALLBACK_BLOCK_COLS if cols > _FALLBACK_BLOCK_COLS else cols

    # Row blocking, rounded to the packed sublane tile (no forced splits on
    # single-TC chips: a one-block tensor stays one wide DMA).
    if block_cols == cols:
        row_bytes = cols * itemsize
        block_rows = max(sub, (_TARGET_BLOCK_BYTES // row_bytes) // sub * sub)
        block_rows = min(block_rows, rows)
    else:
        block_rows = rows  # ragged fallback: rows == 1

    # v7x only: shard the row grid across both TensorCores when worthwhile
    # (each core's share >= 1 MiB and an even number of tiles per core).
    cores = _num_tensorcores()
    use_core_parallel = False
    if cores > 1 and block_cols == cols and rows >= cores * sub:
        row_blocks = pl.cdiv(rows, block_rows)
        if row_blocks < cores:
            per_core_rows = (rows // cores) // sub * sub
            if (per_core_rows >= sub
                    and per_core_rows * cols * itemsize >= _MIN_CORE_BYTES):
                block_rows = per_core_rows
        row_blocks = pl.cdiv(rows, block_rows)
        use_core_parallel = row_blocks >= cores and row_blocks % cores == 0

    grid = (pl.cdiv(rows, block_rows), pl.cdiv(cols, block_cols))

    cost = pl.CostEstimate(
        flops=2 * rows * cols,
        transcendentals=0,
        bytes_accessed=2 * rows * cols * itemsize + 2 * 4,
    )

    def call(semantics):
        return pl.pallas_call(
            _global_scaling_kernel,
            out_shape=jax.ShapeDtypeStruct((rows, cols), x2d.dtype),
            grid_spec=pltpu.PrefetchScalarGridSpec(
                num_scalar_prefetch=2,  # gamma, beta -> SMEM once, before grid
                grid=grid,
                in_specs=[
                    pl.BlockSpec((block_rows, block_cols),
                                 lambda i, j, _g, _b: (i, j)),
                ],
                out_specs=pl.BlockSpec((block_rows, block_cols),
                                       lambda i, j, _g, _b: (i, j)),
            ),
            compiler_params=pltpu.CompilerParams(
                dimension_semantics=semantics,
                vmem_limit_bytes=_VMEM_LIMIT_BYTES,
            ),
            cost_estimate=cost,
        )(gamma32, beta32, x2d)

    if use_core_parallel:
        try:
            return call((pltpu.CORE_PARALLEL, pltpu.PARALLEL))
        except Exception:
            pass  # fall back to portable semantics below
    return call(("parallel", "parallel"))


def global_scaling(latent: jax.Array, gamma: jax.Array, beta: jax.Array) -> jax.Array:
    """Elementwise affine: latent * gamma + beta (gamma/beta scalar fp32 params)."""
    orig_shape = latent.shape
    n = 1
    for d in orig_shape:
        n *= int(d)
    if n == 0:
        return latent

    gamma32 = jnp.asarray(gamma, jnp.float32).reshape(-1)
    beta32 = jnp.asarray(beta, jnp.float32).reshape(-1)
    if gamma32.size != 1 or beta32.size != 1:
        raise ValueError(
            "GlobalScaling expects scalar gamma/beta (nn.Parameter of shape (1,)); "
            f"got sizes {gamma32.size} and {beta32.size}."
        )

    cols = None
    for c in _COL_CANDIDATES:
        if n % c == 0:
            cols = c
            break

    if cols is not None:
        # Hot path: free (bitcast) reshape, no padding, no output slice.
        out2d = _affine_2d(latent.reshape(n // cols, cols), gamma32, beta32)
        return out2d.reshape(orig_shape)

    # Ragged fallback (n not a multiple of 128): (1, n) view tiled along the
    # lane axis; Pallas masks the ragged last block, so there is no pad-copy
    # or slice-copy HBM traffic.
    out2d = _affine_2d(latent.reshape(1, n), gamma32, beta32)
    return out2d.reshape(orig_shape)


if __name__ == "__main__":
    key = jax.random.PRNGKey(0)
    k_x, k_g, k_b = jax.random.split(key, 3)

    # Small NCHW latent consistent with the module's forward.
    x = jax.random.normal(k_x, (2, 4, 16, 16), dtype=jnp.float32)

    # Parameters of shape (1,), as in nn.Parameter(torch.randn(1)).
    gamma = jax.random.normal(k_g, (1,), dtype=jnp.float32)
    beta = jax.random.normal(k_b, (1,), dtype=jnp.float32)

    out = jax.block_until_ready(global_scaling(x, gamma, beta))
    ref = x * gamma + beta
    assert out.shape == x.shape and out.dtype == x.dtype
    assert jnp.allclose(out, ref, atol=1e-5, rtol=1e-5)

    # Larger latent: multi-row blocks on the hot path.
    x_big = jax.random.normal(k_x, (2, 16, 64, 64), dtype=jnp.float32)
    out_big = jax.block_until_ready(global_scaling(x_big, gamma, beta))
    assert jnp.allclose(out_big, x_big * gamma + beta, atol=1e-5, rtol=1e-5)

    # bf16 latent: exercises the dtype-aware sublane rounding (16-row tiles).
    x_bf16 = x_big.astype(jnp.bfloat16)
    out_bf16 = jax.block_until_ready(global_scaling(x_bf16, gamma, beta))
    ref_bf16 = (x_bf16.astype(jnp.float32) * gamma + beta).astype(jnp.bfloat16)
    assert out_bf16.dtype == jnp.bfloat16
    assert jnp.allclose(out_bf16.astype(jnp.float32),
                        ref_bf16.astype(jnp.float32), atol=1e-2, rtol=1e-2)

    # Non-128-aligned fallback path ((1, n) lane-tiled view, no pad copies).
    x_odd = jax.random.normal(k_b, (3, 5, 7), dtype=jnp.float32)
    out_odd = jax.block_until_ready(global_scaling(x_odd, gamma, beta))
    assert jnp.allclose(out_odd, x_odd * gamma + beta, atol=1e-5, rtol=1e-5)

    print("KERNEL_OK")
</pallas_src>

<mosaic_0001>
module attributes {stable_mosaic.version = 11 : i64} {
  func.func @_global_scaling_kernel(%arg0: i32, %arg1: i32, %arg2: memref<1xf32, #tpu.memory_space<smem>>, %arg3: memref<1xf32, #tpu.memory_space<smem>>, %arg4: memref<1x2048xf32, #tpu.memory_space<vmem>>, %arg5: memref<1x2048xf32, #tpu.memory_space<vmem>>) attributes {dimension_semantics = [#tpu.dimension_semantics<parallel>, #tpu.dimension_semantics<parallel>], iteration_bounds = array<i64: 1, 1>, scalar_prefetch = 2 : i64, scratch_operands = 0 : i64, tpu.core_type = #tpu.core_type<tc>, window_params = [{transform_indices = @transform_0, window_bounds = array<i64: 1, 2048>}, {transform_indices = @transform_1, window_bounds = array<i64: 1, 2048>}]} {
    %c0 = arith.constant 0 : index
    %0 = memref.load %arg2[%c0] : memref<1xf32, #tpu.memory_space<smem>>
    %c0_0 = arith.constant 0 : index
    %1 = memref.load %arg3[%c0_0] : memref<1xf32, #tpu.memory_space<smem>>
    %c0_1 = arith.constant 0 : index
    %c0_2 = arith.constant 0 : index
    %2 = vector.load %arg4[%c0_1, %c0_2] : memref<1x2048xf32, #tpu.memory_space<vmem>>, vector<1x2048xf32>
    %3 = vector.broadcast %0 : f32 to vector<1x2048xf32>
    %4 = arith.mulf %2, %3 : vector<1x2048xf32>
    %5 = vector.broadcast %1 : f32 to vector<1x2048xf32>
    %6 = arith.addf %4, %5 : vector<1x2048xf32>
    %c0_3 = arith.constant 0 : index
    %c0_4 = arith.constant 0 : index
    %7 = vector.load %arg5[%c0_3, %c0_4] : memref<1x2048xf32, #tpu.memory_space<vmem>>, vector<1x2048xf32>
    tpu.vector_store %arg5[%c0_3, %c0_4], %6 {strides = array<i32>} : memref<1x2048xf32, #tpu.memory_space<vmem>>, vector<1x2048xf32>,
    return
  }
  func.func @transform_0(%arg0: i32, %arg1: i32, %arg2: memref<1xf32, #tpu.memory_space<smem>>, %arg3: memref<1xf32, #tpu.memory_space<smem>>) -> (i32, i32) {
    %c0_i32 = arith.constant 0 : i32
    return %arg0, %arg1 : i32, i32
  }
  func.func @transform_1(%arg0: i32, %arg1: i32, %arg2: memref<1xf32, #tpu.memory_space<smem>>, %arg3: memref<1xf32, #tpu.memory_space<smem>>) -> (i32, i32) {
    %c0_i32 = arith.constant 0 : i32
    return %arg0, %arg1 : i32, i32
  }
}

</mosaic_0001>

<bundles_post_ra>
// kernel: tpu_custom_call.1
= control target key start
LH: loop header
LB: loop body
LE: loop exit
PB: predicated region body
PF: predicated region fallthrough
CT: control target
= control target key end

     0   :  { %10 = vsyncpa [#allocation6], 0  ;;  %s132_s0 = inlined_call_operand.<no memory space> [shape: f32[1], index: 0, kind: input, shape index: {}]   ;;  %s133_s1 = inlined_call_operand.<no memory space> [shape: f32[1], index: 1, kind: input, shape index: {}]   ;;  %s134_s2 = inlined_call_operand.hbm [shape: f32[1,2048], index: 2, kind: input, shape index: {}]   ;;  %s135_s3 = inlined_call_operand.hbm [shape: f32[1,2048], index: 3, kind: output, shape index: {}]  }
   0x1   :  { %11 = vsyncpa [#allocation7], 0  ;;  %s98_s12 = smov [#allocation5]  }
   0x2   :  { %s18_s13 = sshll.u32 %s98_s12, 4  ;;  %s19_s13 = int_to_ptr.vmem [resolvable:$true] %s18_s13 }
   0x3   :  { %s62_s14 = scalar_lea.vmem %s19_s13, 256  ;;  %p67_p1 = scmp.lt.s32.totalorder %s19_s13, %s19_s13 }
   0x4   :  { %p63_p0 = scmp.ne.s32.totalorder %s19_s13, %s62_s14  ;;  %p68_p2 = scmp.lt.s32.totalorder %s62_s14, %s62_s14 }
   0x6   :  { %p69_p3 = por %p68_p2, %p67_p1 }
   0x8   :  { %p70_p4 = pnand %p69_p3, %p63_p0 }
   0xa   :  { %73 = shalt.err (!%p70_p4)
}
   0xb   :  { %21 = dma.hbm_to_vmem [thread:$0]  %s134_s2, 256, %s19_s13, [#allocation6]  }
   0xc   :  { %94 = dma.done.wait [#allocation6], 256  }
   0xd   :  { %95 = vsyncadd [#allocation6], 4294967040  ;;  %v29_v0 = vstv %s132_s0  ;;  %v27_v1 = vld [vmem:[#allocation5] sm:$0xff]  ;;  %v32_v2 = vstv %s133_s1  ;;  %v28_v3 = vld [vmem:[#allocation5 + $0x8] sm:$0xff]  ;;  %s99_s21 = smov [#allocation8]  }
   0xe   :  { %s43_s22 = sshll.u32 %s99_s21, 4  ;;  %v30_v4 = vmul.f32 %v29_v0, %v27_v1  ;;  %v31_v5 = vmul.f32 %v29_v0, %v28_v3  ;;  %s44_s22 = int_to_ptr.vmem [resolvable:$true] %s43_s22 }
   0xf   :  { %s74_s2 = scalar_lea.vmem %s44_s22, 256  ;;  %p79_p6 = scmp.lt.s32.totalorder %s44_s22, %s44_s22 }
  0x10   :  { %v33_v6 = vadd.f32 %v32_v2, %v30_v4  ;;  %v34_v7 = vadd.f32 %v32_v2, %v31_v5  ;;  %p75_p5 = scmp.ne.s32.totalorder %s44_s22, %s74_s2  ;;  %p80_p7 = scmp.lt.s32.totalorder %s74_s2, %s74_s2 }
  0x12   :  { %35 = vst [vmem:[#allocation8] sm:$0xff] %v33_v6  ;;  %36 = vst [vmem:[#allocation8 + $0x8] sm:$0xff] %v34_v7  ;;  %p81_p8 = por %p80_p7, %p79_p6 }
  0x14   :  { %p82_p9 = pnand %p81_p8, %p75_p5 }
  0x16   :  { %85 = shalt.err (!%p82_p9)
}
  0x17   :  { %46 = dma.vmem_to_hbm [thread:$0]  %s44_s22, 256, %s135_s3, [#allocation7]  }
  0x18   :  { %96 = dma.done.wait [#allocation7], 256  }
  0x19   :  { %97 = vsyncadd [#allocation7], 4294967040 }
  0x1a   :  { %50 = vsyncpa [#allocation6], 1 }
  0x1b   :  { %51 = vsyncpa [#allocation7], 1 }

</bundles_post_ra>
